<compile_context>
chip_gen: v7x
topology: tpu7x:2x2x1
jax: 0.10.0
libtpu: 0.0.40
codegen_flags: <defaults>
</compile_context>

<pallas_src>
import functools

import jax
import jax.numpy as jnp
from jax.experimental import pallas as pl
from jax.experimental.pallas import tpu as pltpu


_MIB = 1024 * 1024
# Conservative per-kernel VMEM budget that fits every generation's scoped /
# physical limits (v5e 16 MiB scoped default -> raised explicitly below,
# v6e 32 MiB scoped, v7x 32 MiB scoped / 64 MiB physical).
_VMEM_BUDGET = 24 * _MIB
_VMEM_HEADROOM = 8 * _MIB


def _round_up(a, b):
    return (a + b - 1) // b * b


def _patch_embed_kernel(x_ref, w_ref, b_ref, o_ref):
    """One (tm, tn) output tile: full-K dot + f32 bias, f32 MXU accumulation."""
    acc = jnp.dot(x_ref[...], w_ref[...], preferred_element_type=jnp.float32)
    o_ref[...] = (acc + b_ref[...]).astype(o_ref.dtype)


def _vmem_bytes(tm, tn, k, out_itemsize):
    """Conservative footprint: assume double-buffering on every operand."""
    lhs = 2 * tm * k * 2            # bf16 patch rows
    rhs = 2 * k * tn * 2            # bf16 weights
    bias = 2 * tn * 4               # f32 bias row (negligible)
    out = 2 * tm * tn * out_itemsize
    return lhs + rhs + bias + out


def _pick_row_tile(m, tn, k, out_itemsize):
    """Row tile: multiple of 128, <= 512, small zero padding, >= 2 grid steps
    when M allows (so 'parallel' can shard across v7x's two TCs), and a VMEM
    footprint under budget."""
    if m <= 128:
        return 128, 128
    best = None
    for tm in (512, 384, 256, 128):
        if _vmem_bytes(tm, tn, k, out_itemsize) > _VMEM_BUDGET:
            continue
        m_pad = _round_up(m, tm)
        steps = m_pad // tm
        waste_frac = (m_pad - m) / m
        # Penalize >12.5% dead rows and single-step grids, then prefer the
        # larger tile (fewer grid steps -> amortized per-step overhead).
        key = (waste_frac > 0.125, steps == 1, -tm)
        if best is None or key < best[0]:
            best = (key, tm, m_pad)
    if best is None:                      # pathological sizes: smallest tile
        return 128, _round_up(m, 128)
    return best[1], best[2]


def _gemm_bias(lhs, rhs, bias2d, *, tm, tn, out_dtype):
    """out[M_pad, E_pad] = lhs @ rhs + bias.

    lhs: (M_pad, K_pad) bf16, rhs: (K_pad, E_pad) bf16, bias2d: (1, E_pad) f32.
    """
    m_pad, k_pad = lhs.shape
    _, e_pad = rhs.shape
    out_itemsize = jnp.dtype(out_dtype).itemsize
    vmem_limit = int(
        max(_vmem_bytes(tm, tn, k_pad, out_itemsize) + _VMEM_HEADROOM, 16 * _MIB)
    )

    if tn == e_pad:
        # Weights + bias resident for the whole kernel: constant block index,
        # single buffer (no useless double-buffer copy); only the patch rows
        # and the output stream through HBM.
        grid = (m_pad // tm,)
        in_specs = [
            pl.BlockSpec((tm, k_pad), lambda i: (i, 0)),
            pl.BlockSpec((k_pad, e_pad), lambda i: (0, 0),
                         pipeline_mode=pl.Buffered(buffer_count=1)),
            pl.BlockSpec((1, e_pad), lambda i: (0, 0),
                         pipeline_mode=pl.Buffered(buffer_count=1)),
        ]
        out_specs = pl.BlockSpec((tm, e_pad), lambda i: (i, 0))
        dim_sem = ("parallel",)
    else:
        # E does not fit one resident tile (rare for PatchEmbed): make M the
        # *inner* grid axis so each (K, tn) weight tile is DMA'd exactly once;
        # the lhs is re-streamed E/tn times instead (E/tn is small).
        grid = (e_pad // tn, m_pad // tm)
        in_specs = [
            pl.BlockSpec((tm, k_pad), lambda j, i: (i, 0)),
            pl.BlockSpec((k_pad, tn), lambda j, i: (0, j)),
            pl.BlockSpec((1, tn), lambda j, i: (0, j)),
        ]
        out_specs = pl.BlockSpec((tm, tn), lambda j, i: (i, j))
        dim_sem = ("parallel", "parallel")

    return pl.pallas_call(
        _patch_embed_kernel,
        out_shape=jax.ShapeDtypeStruct((m_pad, e_pad), out_dtype),
        grid_spec=pltpu.PrefetchScalarGridSpec(
            num_scalar_prefetch=0,
            grid=grid,
            in_specs=in_specs,
            out_specs=out_specs,
        ),
        compiler_params=pltpu.CompilerParams(
            dimension_semantics=dim_sem,
            vmem_limit_bytes=vmem_limit,
        ),
    )(lhs, rhs, bias2d)


@functools.partial(jax.jit, static_argnums=(3,))
def patch_embed_forward(x, weight, bias, patch_size):
    """x: (B, C, H, W); weight: (E, C, p, p); bias: (E,) -> (B, N, E)."""
    B, C, H, W = x.shape
    E = weight.shape[0]
    p = patch_size
    Hp, Wp = H // p, W // p
    N = Hp * Wp
    M = B * N
    K = C * p * p
    out_dtype = x.dtype
    out_itemsize = jnp.dtype(out_dtype).itemsize

    # --- patch extraction (layout plumbing, XLA) ---------------------------
    # Cast to bf16 *before* the relayout so the extraction pass moves half the
    # HBM bytes.  Per-patch feature order is (C, kh, kw) = Conv2d's reduction
    # order, so the weight needs no permute.
    xb = x.astype(jnp.bfloat16)
    patches = xb.reshape(B, C, Hp, p, Wp, p)
    patches = patches.transpose(0, 2, 4, 1, 3, 5)       # (B, Hp, Wp, C, p, p)
    patches = patches.reshape(M, K)

    w_mat = weight.reshape(E, K).T.astype(jnp.bfloat16)  # (K, E)
    bias2d = bias.astype(jnp.float32).reshape(1, E)

    # --- padding / tiling ---------------------------------------------------
    K_pad = _round_up(K, 128)   # unmasked, fully packed MXU operands
    E_pad = _round_up(E, 128)   # lane-dense (unmasked) output stores

    if K_pad != K:
        patches = jnp.pad(patches, ((0, 0), (0, K_pad - K)))
        w_mat = jnp.pad(w_mat, ((0, K_pad - K), (0, 0)))
    if E_pad != E:
        w_mat = jnp.pad(w_mat, ((0, 0), (0, E_pad - E)))
        bias2d = jnp.pad(bias2d, ((0, 0), (0, E_pad - E)))

    # Keep the whole (K, E) weight resident whenever it fits the VMEM budget
    # together with the streaming buffers; otherwise tile E (rare).
    if _vmem_bytes(128, E_pad, K_pad, out_itemsize) <= _VMEM_BUDGET:
        tn = E_pad
    else:
        tn = next(t for t in (1024, 512, 256, 128) if E_pad % t == 0)

    tm, M_pad = _pick_row_tile(M, tn, K_pad, out_itemsize)
    if M_pad != M:
        patches = jnp.pad(patches, ((0, M_pad - M), (0, 0)))

    out = _gemm_bias(patches, w_mat, bias2d, tm=tm, tn=tn, out_dtype=out_dtype)

    out = out[:M, :E]
    return out.reshape(B, N, E)


if __name__ == "__main__":
    # Small deterministic config consistent with the module; chosen so the
    # K (48 -> 128) and E (96 -> 128) padding paths are both exercised.
    B, C, H, W = 2, 3, 16, 16
    patch_size = 4
    embed_dim = 96

    key = jax.random.PRNGKey(0)
    kx, kw, kb = jax.random.split(key, 3)

    x = jax.random.normal(kx, (B, C, H, W), dtype=jnp.float32)
    weight = (
        jax.random.normal(kw, (embed_dim, C, patch_size, patch_size), dtype=jnp.float32)
        * 0.02
    )
    bias = jax.random.normal(kb, (embed_dim,), dtype=jnp.float32) * 0.02

    out = patch_embed_forward(x, weight, bias, patch_size)
    out = jax.block_until_ready(out)

    # Reference (plain JAX conv, NCHW).  Inputs are cast through bf16 exactly
    # like the kernel does, so the only difference is accumulation order.
    x_bf = x.astype(jnp.bfloat16).astype(jnp.float32)
    w_bf = weight.astype(jnp.bfloat16).astype(jnp.float32)
    ref = jax.lax.conv_general_dilated(
        x_bf, w_bf,
        window_strides=(patch_size, patch_size),
        padding="VALID",
        dimension_numbers=("NCHW", "OIHW", "NCHW"),
    )  # (B, E, Hp, Wp)
    ref = ref + bias[None, :, None, None]
    ref = ref.reshape(B, embed_dim, -1).transpose(0, 2, 1)  # (B, N, E)

    N = (H // patch_size) * (W // patch_size)
    assert out.shape == (B, N, embed_dim)
    assert jnp.allclose(out, ref, atol=2e-3, rtol=2e-3)
    print("KERNEL_OK")
</pallas_src>

<mosaic_0001>
module attributes {stable_mosaic.version = 11 : i64} {
  func.func @_patch_embed_kernel(%arg0: i32, %arg1: memref<128x128xbf16, #tpu.memory_space<vmem>>, %arg2: memref<128x128xbf16, #tpu.memory_space<vmem>>, %arg3: memref<1x128xf32, #tpu.memory_space<vmem>>, %arg4: memref<128x128xf32, #tpu.memory_space<vmem>>) attributes {dimension_semantics = [#tpu.dimension_semantics<parallel>], iteration_bounds = array<i64: 1>, scalar_prefetch = 0 : i64, scratch_operands = 0 : i64, tpu.core_type = #tpu.core_type<tc>, window_params = [{transform_indices = @transform_0, window_bounds = array<i64: 128, 128>}, {pipeline_mode = #tpu.pipeline_mode<synchronous>, transform_indices = @transform_1, window_bounds = array<i64: 128, 128>}, {pipeline_mode = #tpu.pipeline_mode<synchronous>, transform_indices = @transform_2, window_bounds = array<i64: 1, 128>}, {transform_indices = @transform_3, window_bounds = array<i64: 128, 128>}]} {
    %c0 = arith.constant 0 : index
    %c0_0 = arith.constant 0 : index
    %0 = vector.load %arg1[%c0, %c0_0] : memref<128x128xbf16, #tpu.memory_space<vmem>>, vector<128x128xbf16>
    %c0_1 = arith.constant 0 : index
    %c0_2 = arith.constant 0 : index
    %1 = vector.load %arg2[%c0_1, %c0_2] : memref<128x128xbf16, #tpu.memory_space<vmem>>, vector<128x128xbf16>
    %cst = arith.constant dense<0.000000e+00> : vector<128x128xf32>
    %2 = tpu.matmul %0, %1, %cst {dimension_numbers = #tpu.dot_dimension_numbers<[1], [0], [0], [1], [0, 0, 1, 1], [], []>} : vector<128x128xbf16>, vector<128x128xbf16>, vector<128x128xf32> -> vector<128x128xf32>
    %c0_3 = arith.constant 0 : index
    %c0_4 = arith.constant 0 : index
    %3 = vector.load %arg3[%c0_3, %c0_4] : memref<1x128xf32, #tpu.memory_space<vmem>>, vector<1x128xf32>
    %4 = vector.broadcast %3 : vector<1x128xf32> to vector<128x128xf32>
    %5 = arith.addf %2, %4 : vector<128x128xf32>
    %c0_5 = arith.constant 0 : index
    %c0_6 = arith.constant 0 : index
    %6 = vector.load %arg4[%c0_5, %c0_6] : memref<128x128xf32, #tpu.memory_space<vmem>>, vector<128x128xf32>
    tpu.vector_store %arg4[%c0_5, %c0_6], %5 {strides = array<i32>} : memref<128x128xf32, #tpu.memory_space<vmem>>, vector<128x128xf32>,
    return
  }
  func.func @transform_0(%arg0: i32) -> (i32, i32) {
    %c0_i32 = arith.constant 0 : i32
    %c0_i32_0 = arith.constant 0 : i32
    return %arg0, %c0_i32 : i32, i32
  }
  func.func @transform_1(%arg0: i32) -> (i32, i32) {
    %c0_i32 = arith.constant 0 : i32
    %c0_i32_0 = arith.constant 0 : i32
    %c0_i32_1 = arith.constant 0 : i32
    return %c0_i32, %c0_i32_0 : i32, i32
  }
  func.func @transform_2(%arg0: i32) -> (i32, i32) {
    %c0_i32 = arith.constant 0 : i32
    %c0_i32_0 = arith.constant 0 : i32
    %c0_i32_1 = arith.constant 0 : i32
    return %c0_i32, %c0_i32_0 : i32, i32
  }
  func.func @transform_3(%arg0: i32) -> (i32, i32) {
    %c0_i32 = arith.constant 0 : i32
    %c0_i32_0 = arith.constant 0 : i32
    return %arg0, %c0_i32 : i32, i32
  }
}

</mosaic_0001>

<bundles_post_ra>
// kernel: patch_embed_forward.1
= control target key start
LH: loop header
LB: loop body
LE: loop exit
PB: predicated region body
PF: predicated region fallthrough
CT: control target
= control target key end

     0   :  { %s483_s1 = inlined_call_operand.vmem [shape: bf16[128,128], index: 1, kind: input, shape index: {}]   ;;  %s484_s0 = inlined_call_operand.vmem [shape: bf16[128,128], index: 0, kind: input, shape index: {}]   ;;  %s485_s2 = inlined_call_operand.vmem [shape: f32[1,128], index: 2, kind: input, shape index: {}]   ;;  %s486_s3 = inlined_call_operand.vmem [shape: f32[128,128], index: 3, kind: output, shape index: {}]  }
   0x1   :  { %v348_v0 = vld [vmem:[%s483_s1] sm:$0xff]   ;;  %v349_v1 = vld [vmem:[%s483_s1 + $0x8] sm:$0xff]   ;;  %v350_v2 = vld [vmem:[%s483_s1 + $0x10] sm:$0xff]  }
   0x2   :  { %300 = vmatprep.subr.bf16.mxu0 %v348_v0  ;;  %332 = vmatprep.subr.bf16.mxu1 %v348_v0  ;;  %v351_v3 = vld [vmem:[%s483_s1 + $0x18] sm:$0xff]   ;;  %v356_v4 = vld [vmem:[%s484_s0] sm:$0xff]   ;;  %v353_v7 = vld [vmem:[%s483_s1 + $0x28] sm:$0xff]  }
   0x3   :  { %301 = vmatpush3.bf16.msra.mxu0 %v348_v0  ;;  %340 = vmatpush3.bf16.msra.mxu1 %v348_v0  ;;  %v357_v5 = vld [vmem:[%s484_s0 + $0x20] sm:$0xff]   ;;  %v354_v8 = vld [vmem:[%s483_s1 + $0x30] sm:$0xff]   ;;  %v355_v9 = vld [vmem:[%s483_s1 + $0x38] sm:$0xff]  }
   0x4   :  { %302 = vmatprep.subr.bf16.mxu0 %v349_v1  ;;  %333 = vmatprep.subr.bf16.mxu1 %v349_v1  ;;  %v352_v6 = vld [vmem:[%s483_s1 + $0x20] sm:$0xff]   ;;  %v358_v10 = vld [vmem:[%s484_s0 + $0x8] sm:$0xff]   ;;  %v360_v12 = vld [vmem:[%s484_s0 + $0x10] sm:$0xff]  }
   0x5   :  { %316 = vmatprep.mubr.bf16.mxu0 %v356_v4  ;;  %324 = vmatprep.mubr.bf16.mxu1 %v357_v5  ;;  %v359_v11 = vld [vmem:[%s484_s0 + $0x28] sm:$0xff]   ;;  %v361_v13 = vld [vmem:[%s484_s0 + $0x30] sm:$0xff]   ;;  %v362_v14 = vld [vmem:[%s484_s0 + $0x18] sm:$0xff]  }
   0x6   :  { %v363_v15 = vld [vmem:[%s484_s0 + $0x38] sm:$0xff]   ;;  %v267_v16 = vld [vmem:[%s485_s2] ss:$0 sm:$0xff] }
   0x7   :  { %303 = vmatpush3.bf16.msra.mxu0 %v349_v1  ;;  %341 = vmatpush3.bf16.msra.mxu1 %v349_v1 }
   0x8   :  { %304 = vmatprep.subr.bf16.mxu0 %v350_v2  ;;  %334 = vmatprep.subr.bf16.mxu1 %v350_v2 }
   0xb   :  { %305 = vmatpush3.bf16.msra.mxu0 %v350_v2  ;;  %342 = vmatpush3.bf16.msra.mxu1 %v350_v2 }
   0xc   :  { %306 = vmatprep.subr.bf16.mxu0 %v351_v3  ;;  %335 = vmatprep.subr.bf16.mxu1 %v351_v3 }
   0xf   :  { %307 = vmatpush3.bf16.msra.mxu0 %v351_v3  ;;  %343 = vmatpush3.bf16.msra.mxu1 %v351_v3 }
  0x10   :  { %308 = vmatprep.subr.bf16.mxu0 %v352_v6  ;;  %336 = vmatprep.subr.bf16.mxu1 %v352_v6 }
  0x13   :  { %309 = vmatpush3.bf16.msra.mxu0 %v352_v6  ;;  %344 = vmatpush3.bf16.msra.mxu1 %v352_v6 }
  0x14   :  { %310 = vmatprep.subr.bf16.mxu0 %v353_v7  ;;  %337 = vmatprep.subr.bf16.mxu1 %v353_v7 }
  0x17   :  { %311 = vmatpush3.bf16.msra.mxu0 %v353_v7  ;;  %345 = vmatpush3.bf16.msra.mxu1 %v353_v7 }
  0x18   :  { %312 = vmatprep.subr.bf16.mxu0 %v354_v8  ;;  %338 = vmatprep.subr.bf16.mxu1 %v354_v8 }
  0x1b   :  { %313 = vmatpush3.bf16.msra.mxu0 %v354_v8  ;;  %346 = vmatpush3.bf16.msra.mxu1 %v354_v8 }
  0x1c   :  { %314 = vmatprep.subr.bf16.mxu0 %v355_v9  ;;  %339 = vmatprep.subr.bf16.mxu1 %v355_v9 }
  0x1f   :  { %315 = vmatpush3.bf16.msra.mxu0 %v355_v9  ;;  %347 = vmatpush3.bf16.msra.mxu1 %v355_v9 }
  0x22   :  { %317 = vmatmul.mubr.bf16.vlgmr.msra.gmra.mrb[0].mxu0 %v358_v10  ;;  %325 = vmatmul.mubr.bf16.vlgmr.msra.gmra.mrb[0].mxu1 %v359_v11 }
  0x23   :  { %320 = vmatprep.mubr.bf16.mxu0 %v360_v12  ;;  %328 = vmatprep.mubr.bf16.mxu1 %v361_v13 }
  0x2a   :  { %321 = vmatmul.mubr.bf16.gmra.mrb[4].mxu0 %v362_v14  ;;  %329 = vmatmul.mubr.bf16.gmra.mrb[4].mxu1 %v363_v15 }
  0xf5   :  { %v318_v17 = vpop.f32.mrb[0].mxu0  ;;  %v326_v18 = vpop.f32.mrb[0].mxu1 }
  0xf6   :  { %v193_v19 = vadd.f32 %v318_v17, %v267_v16  ;;  %v225_v20 = vadd.f32 %v326_v18, %v267_v16  ;;  %v184_v21 = vpop.f32.mrb[1].mxu0  ;;  %v216_v22 = vpop.f32.mrb[1].mxu1 }
  0xf7   :  { %v185_v23 = vadd.f32 %v267_v16, %v184_v21  ;;  %v217_v24 = vadd.f32 %v267_v16, %v216_v22  ;;  %v319_v25 = vpop.f32.mrb[2].mxu0  ;;  %v327_v26 = vpop.f32.mrb[2].mxu1 }
  0xf8   :  { %249 = vst [vmem:[%s486_s3 + $0x10] sm:$0xff] %v193_v19  ;;  %257 = vst [vmem:[%s486_s3 + $0x50] sm:$0xff] %v225_v20  ;;  %v196_v27 = vadd.f32 %v319_v25, %v267_v16  ;;  %v228_v28 = vadd.f32 %v327_v26, %v267_v16  ;;  %v187_v29 = vpop.f32.mrb[3].mxu0  ;;  %v219_v30 = vpop.f32.mrb[3].mxu1 }
  0xf9   :  { %247 = vst [vmem:[%s486_s3] sm:$0xff] %v185_v23  ;;  %255 = vst [vmem:[%s486_s3 + $0x40] sm:$0xff] %v217_v24  ;;  %v188_v31 = vadd.f32 %v267_v16, %v187_v29  ;;  %v220_v32 = vadd.f32 %v267_v16, %v219_v30 }
  0xfa   :  { %250 = vst [vmem:[%s486_s3 + $0x18] sm:$0xff] %v196_v27  ;;  %258 = vst [vmem:[%s486_s3 + $0x58] sm:$0xff] %v228_v28 }
  0xfb   :  { %248 = vst [vmem:[%s486_s3 + $0x8] sm:$0xff] %v188_v31  ;;  %256 = vst [vmem:[%s486_s3 + $0x48] sm:$0xff] %v220_v32 }
  0xfd   :  { %v322_v33 = vpop.f32.mrb[4].mxu0  ;;  %v330_v34 = vpop.f32.mrb[4].mxu1 }
  0xfe   :  { %v209_v35 = vadd.f32 %v322_v33, %v267_v16  ;;  %v241_v36 = vadd.f32 %v330_v34, %v267_v16  ;;  %v200_v37 = vpop.f32.mrb[5].mxu0  ;;  %v232_v38 = vpop.f32.mrb[5].mxu1 }
  0xff   :  { %v201_v39 = vadd.f32 %v267_v16, %v200_v37  ;;  %v233_v40 = vadd.f32 %v267_v16, %v232_v38  ;;  %v323_v41 = vpop.f32.mrb[6].mxu0  ;;  %v331_v42 = vpop.f32.mrb[6].mxu1 }
 0x100   :  { %253 = vst [vmem:[%s486_s3 + $0x30] sm:$0xff] %v209_v35  ;;  %261 = vst [vmem:[%s486_s3 + $0x70] sm:$0xff] %v241_v36  ;;  %v212_v43 = vadd.f32 %v323_v41, %v267_v16  ;;  %v244_v44 = vadd.f32 %v331_v42, %v267_v16  ;;  %v203_v45 = vpop.f32.mrb[7].mxu0  ;;  %v235_v46 = vpop.f32.mrb[7].mxu1 }
 0x101   :  { %251 = vst [vmem:[%s486_s3 + $0x20] sm:$0xff] %v201_v39  ;;  %259 = vst [vmem:[%s486_s3 + $0x60] sm:$0xff] %v233_v40  ;;  %v204_v47 = vadd.f32 %v267_v16, %v203_v45  ;;  %v236_v48 = vadd.f32 %v267_v16, %v235_v46 }
 0x102   :  { %254 = vst [vmem:[%s486_s3 + $0x38] sm:$0xff] %v212_v43  ;;  %262 = vst [vmem:[%s486_s3 + $0x78] sm:$0xff] %v244_v44 }
 0x103   :  { %252 = vst [vmem:[%s486_s3 + $0x28] sm:$0xff] %v204_v47  ;;  %260 = vst [vmem:[%s486_s3 + $0x68] sm:$0xff] %v236_v48 }

</bundles_post_ra>
